<compile_context>
chip_gen: v6e
topology: v6e:2x2x1
jax: 0.10.0
libtpu: 0.0.40
codegen_flags: <defaults>
</compile_context>

<pallas_src>
import functools

import jax
import jax.numpy as jnp
from jax import lax
from jax.experimental import pallas as pl
from jax.experimental.pallas import tpu as pltpu


def _round_up(x, m):
    return ((x + m - 1) // m) * m


def _choose_k_tiling(repr_dim, max_tk=4096):
    """Pick (TK, Kp): TK a multiple of 128, Kp = ceil(repr_dim/TK)*TK.

    Prefers candidates whose K padding is small (wasted HBM traffic / MXU
    cycles), then the fewest grid steps (per-step pipeline overhead)."""
    kp128 = _round_up(repr_dim, 128)
    if kp128 <= max_tk:
        return kp128, kp128            # single K step, minimal padding
    waste_budget = max(128, repr_dim // 64)        # ~1.5% of repr_dim
    best = None
    for mult in range(max_tk // 128, 0, -1):
        tk = mult * 128
        kp = _round_up(repr_dim, tk)
        waste = kp - repr_dim
        steps = kp // tk
        key = (waste > waste_budget, steps, waste)
        if best is None or key < best[0]:
            best = (key, tk, kp)
    return best[1], best[2]


def _choose_batch_tiling(B):
    b8 = _round_up(B, 8)
    if b8 >= 1024:
        TB = 512          # big tiles: amortise w0 streaming + epilogue cost
    elif b8 >= 512:
        TB = 256          # still >= 2 batch tiles -> both v7x TCs busy
    elif b8 >= 256:
        TB = 128
    else:
        TB = b8           # small batches: one tile
    return TB, _round_up(B, TB)


def actor_kernel(obs_ref,                       # (TB, TK)  obs dtype (f32 ok)
                 w0_ref, b0_ref,                # trunk Linear
                 g_ref, beta_ref,               # LayerNorm affine (f32)
                 w1_ref, b1_ref,                # policy Linear 1
                 w2_ref, b2_ref,                # policy Linear 2
                 w3_ref, b3_ref,                # policy Linear 3
                 mu_ref,                        # (TB, Ap)  f32 output
                 acc_ref,                       # (TB, Fp)  f32 scratch
                 *, feature_dim):
    k = pl.program_id(1)
    nk = pl.num_programs(1)
    mm_dtype = w0_ref.dtype

    @pl.when(k == 0)
    def _():
        # Fold the trunk bias into the accumulator init (saves a VPU add in
        # the epilogue).  Padded feature lanes of b0 are exact zeros.
        acc_ref[...] = jnp.broadcast_to(b0_ref[...], acc_ref.shape)

    # K-tiled first matmul, f32 accumulation in VMEM scratch (MXU).  The obs
    # tile is cast to the matmul dtype here (no wrapper-side cast pass).
    acc_ref[...] += jnp.dot(obs_ref[...].astype(mm_dtype), w0_ref[...],
                            preferred_element_type=jnp.float32)

    @pl.when(k == nk - 1)
    def _():
        h = acc_ref[...]                                   # (TB, Fp) f32, bias included

        # LayerNorm over the first `feature_dim` (valid) lanes.  Padded lanes
        # of h are exactly zero (zero-padded w0 columns / b0), so the mean
        # needs no mask; only the centered values are re-masked for variance.
        lane = lax.broadcasted_iota(jnp.int32, h.shape, dimension=1)
        mask = (lane < feature_dim).astype(jnp.float32)
        inv_f = jnp.float32(1.0 / feature_dim)
        mean = jnp.sum(h, axis=-1, keepdims=True) * inv_f
        diff = (h - mean) * mask
        var = jnp.sum(diff * diff, axis=-1, keepdims=True) * inv_f
        h = (h - mean) * lax.rsqrt(var + 1e-5)
        h = jnp.tanh(h * g_ref[...] + beta_ref[...])       # padded lanes -> tanh(0)=0

        # policy MLP: Linear -> ReLU -> Linear -> ReLU -> Linear -> Tanh
        h1 = jnp.dot(h.astype(mm_dtype), w1_ref[...],
                     preferred_element_type=jnp.float32) + b1_ref[...]
        h1 = jnp.maximum(h1, 0.0)
        h2 = jnp.dot(h1.astype(mm_dtype), w2_ref[...],
                     preferred_element_type=jnp.float32) + b2_ref[...]
        h2 = jnp.maximum(h2, 0.0)
        mu = jnp.dot(h2.astype(mm_dtype), w3_ref[...],
                     preferred_element_type=jnp.float32) + b3_ref[...]
        mu_ref[...] = jnp.tanh(mu).astype(mu_ref.dtype)


def prepare_params(params, *, compute_dtype=jnp.bfloat16, max_tk=4096):
    """Pad + cast the (fixed) Actor parameters once.  Hoisted out of the
    per-call path: w0 alone is tens of MB of otherwise-repeated HBM traffic."""
    repr_dim, feature_dim = params["w0"].shape
    hidden_dim = params["w1"].shape[1]
    action_dim = params["w3"].shape[1]

    Fp = _round_up(feature_dim, 128)
    Hp = _round_up(hidden_dim, 128)
    Ap = _round_up(action_dim, 128)
    TK, Kp = _choose_k_tiling(repr_dim, max_tk)
    f32 = jnp.float32

    def pad2(a, r, c, dtype):
        a = jnp.asarray(a)
        return jnp.pad(a, ((0, r - a.shape[0]), (0, c - a.shape[1]))).astype(dtype)

    return {
        "dims": dict(repr_dim=repr_dim, feature_dim=feature_dim,
                     hidden_dim=hidden_dim, action_dim=action_dim,
                     Fp=Fp, Hp=Hp, Ap=Ap, TK=TK, Kp=Kp),
        "w0": pad2(params["w0"], Kp, Fp, compute_dtype),
        "b0": pad2(params["b0"], 1, Fp, f32),
        "ln_g": pad2(params["ln_g"], 1, Fp, f32),
        "ln_b": pad2(params["ln_b"], 1, Fp, f32),
        "w1": pad2(params["w1"], Fp, Hp, compute_dtype),
        "b1": pad2(params["b1"], 1, Hp, f32),
        "w2": pad2(params["w2"], Hp, Hp, compute_dtype),
        "b2": pad2(params["b2"], 1, Hp, f32),
        "w3": pad2(params["w3"], Hp, Ap, compute_dtype),
        "b3": pad2(params["b3"], 1, Ap, f32),
    }


def actor_forward(obs, std_scalar, prepared):
    d = prepared["dims"]
    B, repr_dim = obs.shape
    assert repr_dim == d["repr_dim"], "obs feature dim mismatch with params"
    fd, hd, ad = d["feature_dim"], d["hidden_dim"], d["action_dim"]
    Fp, Hp, Ap, TK, Kp = d["Fp"], d["Hp"], d["Ap"], d["TK"], d["Kp"]
    TB, Bp = _choose_batch_tiling(B)

    # obs goes straight into the kernel in its own dtype (no cast pre-pass);
    # pad only when the batch / K extents actually need alignment.
    obs_p = obs
    if Bp != B or Kp != repr_dim:
        obs_p = jnp.pad(obs, ((0, Bp - B), (0, Kp - repr_dim)))

    grid = (Bp // TB, Kp // TK)
    n_btiles = Bp // TB
    const = lambda i, k: (0, 0)

    obs_it = obs_p.dtype.itemsize
    wdt = prepared["w0"].dtype.itemsize

    # Double-buffered VMEM footprint estimate -> scoped VMEM limit (keeps a
    # comfortable margin under v7x's 64 MiB per-TC budget at these tile caps).
    vmem_est = (2 * TB * TK * obs_it                       # obs tiles
                + 2 * TK * Fp * wdt                        # w0 K tiles
                + 2 * (Fp * Hp + Hp * Hp + Hp * Ap) * wdt  # resident MLP weights
                + TB * Fp * 4                              # accumulator scratch
                + 2 * TB * Ap * 4                          # output tiles
                + 2 * (4 * Fp + 2 * Hp + Ap) * 4)          # biases / LN params
    vmem_limit = int(min(64 * 2 ** 20, max(32 * 2 ** 20, int(vmem_est * 1.3))))

    flops = 2 * B * (repr_dim * fd + fd * hd + hd * hd + hd * ad)
    transcendentals = B * (fd + ad + 1)
    w0_bytes = prepared["w0"].size * wdt
    other_param_bytes = sum(
        prepared[k].size * prepared[k].dtype.itemsize
        for k in ("b0", "ln_g", "ln_b", "w1", "b1", "w2", "b2", "w3", "b3"))
    bytes_accessed = int(obs_p.size * obs_it            # obs streamed once
                         + n_btiles * w0_bytes          # w0 re-streamed per batch tile
                         + other_param_bytes            # resident params fetched once
                         + Bp * Ap * 4)                 # mu writeback

    mu_p = pl.pallas_call(
        functools.partial(actor_kernel, feature_dim=fd),
        out_shape=jax.ShapeDtypeStruct((Bp, Ap), jnp.float32),
        grid_spec=pltpu.PrefetchScalarGridSpec(
            num_scalar_prefetch=0,
            grid=grid,
            in_specs=[
                pl.BlockSpec((TB, TK), lambda i, k: (i, k)),   # obs tile (streamed)
                pl.BlockSpec((TK, Fp), lambda i, k: (k, 0)),   # w0 K-tile (streamed)
                pl.BlockSpec((1, Fp), const),                  # b0
                pl.BlockSpec((1, Fp), const),                  # LN gamma
                pl.BlockSpec((1, Fp), const),                  # LN beta
                pl.BlockSpec((Fp, Hp), const),                 # w1 (VMEM-resident)
                pl.BlockSpec((1, Hp), const),                  # b1
                pl.BlockSpec((Hp, Hp), const),                 # w2 (VMEM-resident)
                pl.BlockSpec((1, Hp), const),                  # b2
                pl.BlockSpec((Hp, Ap), const),                 # w3 (VMEM-resident)
                pl.BlockSpec((1, Ap), const),                  # b3
            ],
            out_specs=pl.BlockSpec((TB, Ap), lambda i, k: (i, 0)),
            scratch_shapes=[pltpu.VMEM((TB, Fp), jnp.float32)],
        ),
        compiler_params=pltpu.CompilerParams(
            dimension_semantics=("parallel", "arbitrary"),
            vmem_limit_bytes=vmem_limit,
        ),
        cost_estimate=pl.CostEstimate(
            flops=flops,
            transcendentals=transcendentals,
            bytes_accessed=bytes_accessed),
    )(obs_p, prepared["w0"], prepared["b0"], prepared["ln_g"], prepared["ln_b"],
      prepared["w1"], prepared["b1"], prepared["w2"], prepared["b2"],
      prepared["w3"], prepared["b3"])

    mu = mu_p[:B, :ad]
    # std is a constant broadcast; computed XLA-side, never stored by kernel.
    std = jnp.full((B, ad), std_scalar, dtype=jnp.float32)
    # TODO(synk): TruncatedNormal distribution object has no Pallas equivalent;
    # we return its defining parameters (mu, std).
    return mu, std


def init_params(key, repr_dim, feature_dim, hidden_dim, action_dim):
    ks = jax.random.split(key, 4)

    def lin(kw, fan_in, fan_out):
        return jax.random.normal(kw, (fan_in, fan_out), jnp.float32) / jnp.sqrt(fan_in)

    return {
        "w0": lin(ks[0], repr_dim, feature_dim),
        "b0": jnp.zeros((1, feature_dim), jnp.float32),
        "ln_g": jnp.ones((1, feature_dim), jnp.float32),
        "ln_b": jnp.zeros((1, feature_dim), jnp.float32),
        "w1": lin(ks[1], feature_dim, hidden_dim),
        "b1": jnp.zeros((1, hidden_dim), jnp.float32),
        "w2": lin(ks[2], hidden_dim, hidden_dim),
        "b2": jnp.zeros((1, hidden_dim), jnp.float32),
        "w3": lin(ks[3], hidden_dim, action_dim),
        "b3": jnp.zeros((1, action_dim), jnp.float32),
    }


def reference_forward(obs, std_scalar, params):
    # pure-JAX reference mirroring the PyTorch module (high-precision matmuls)
    hp = lax.Precision.HIGHEST
    h = jnp.dot(obs, params["w0"], precision=hp) + params["b0"]
    mean = jnp.mean(h, axis=-1, keepdims=True)
    var = jnp.mean((h - mean) ** 2, axis=-1, keepdims=True)
    h = (h - mean) / jnp.sqrt(var + 1e-5)
    h = h * params["ln_g"] + params["ln_b"]
    h = jnp.tanh(h)
    h = jnp.maximum(jnp.dot(h, params["w1"], precision=hp) + params["b1"], 0.0)
    h = jnp.maximum(jnp.dot(h, params["w2"], precision=hp) + params["b2"], 0.0)
    mu = jnp.tanh(jnp.dot(h, params["w3"], precision=hp) + params["b3"])
    return mu, jnp.ones_like(mu) * std_scalar


if __name__ == "__main__":
    key = jax.random.PRNGKey(0)
    k_obs, k_par = jax.random.split(key)

    # Small shapes consistent with Actor(repr_dim, action_shape, feature_dim,
    # hidden_dim); feature/hidden/action deliberately non-multiples of 128 to
    # exercise the padding + masked-LayerNorm path; batch not a multiple of 8
    # to exercise the row-padding path.
    B, repr_dim, feature_dim, hidden_dim, action_dim = 12, 1024, 50, 64, 6

    obs = jax.random.normal(k_obs, (B, repr_dim), jnp.float32)
    std = 0.2
    params = init_params(k_par, repr_dim, feature_dim, hidden_dim, action_dim)

    mu_ref, std_ref = reference_forward(obs, std, params)

    # f32 matmul operands, small forced TK so the multi-step K accumulator runs.
    prep32 = prepare_params(params, compute_dtype=jnp.float32, max_tk=512)
    mu32, std32 = actor_forward(obs, std, prep32)
    jax.block_until_ready((mu32, std32))
    assert mu32.shape == (B, action_dim) and std32.shape == (B, action_dim)
    assert jnp.allclose(mu32, mu_ref, atol=2e-2), "f32 mu mismatch vs reference"
    assert jnp.allclose(std32, std_ref, atol=1e-6), "std mismatch vs reference"

    # bf16 matmul operands (default tiling: single K step), f32 accumulation.
    prep16 = prepare_params(params, compute_dtype=jnp.bfloat16)
    mu16, std16 = actor_forward(obs, std, prep16)
    jax.block_until_ready((mu16, std16))
    assert mu16.shape == (B, action_dim) and std16.shape == (B, action_dim)
    assert jnp.allclose(mu16, mu_ref, atol=5e-2), "bf16 mu mismatch vs reference"

    print("KERNEL_OK")
</pallas_src>

<mosaic_0001>
module attributes {stable_mosaic.version = 11 : i64} {
  func.func @actor_kernel(%arg0: i32, %arg1: i32, %arg2: memref<16x512xf32, #tpu.memory_space<vmem>>, %arg3: memref<512x128xf32, #tpu.memory_space<vmem>>, %arg4: memref<1x128xf32, #tpu.memory_space<vmem>>, %arg5: memref<1x128xf32, #tpu.memory_space<vmem>>, %arg6: memref<1x128xf32, #tpu.memory_space<vmem>>, %arg7: memref<128x128xf32, #tpu.memory_space<vmem>>, %arg8: memref<1x128xf32, #tpu.memory_space<vmem>>, %arg9: memref<128x128xf32, #tpu.memory_space<vmem>>, %arg10: memref<1x128xf32, #tpu.memory_space<vmem>>, %arg11: memref<128x128xf32, #tpu.memory_space<vmem>>, %arg12: memref<1x128xf32, #tpu.memory_space<vmem>>, %arg13: memref<16x128xf32, #tpu.memory_space<vmem>>, %arg14: memref<16x128xf32, #tpu.memory_space<vmem>>) attributes {dimension_semantics = [#tpu.dimension_semantics<parallel>, #tpu.dimension_semantics<arbitrary>], iteration_bounds = array<i64: 1, 2>, scalar_prefetch = 0 : i64, scratch_operands = 1 : i64, tpu.core_type = #tpu.core_type<tc>, window_params = [{transform_indices = @transform_0, window_bounds = array<i64: 16, 512>}, {transform_indices = @transform_1, window_bounds = array<i64: 512, 128>}, {pipeline_mode = #tpu.pipeline_mode<synchronous>, transform_indices = @transform_2, window_bounds = array<i64: 1, 128>}, {pipeline_mode = #tpu.pipeline_mode<synchronous>, transform_indices = @transform_3, window_bounds = array<i64: 1, 128>}, {pipeline_mode = #tpu.pipeline_mode<synchronous>, transform_indices = @transform_4, window_bounds = array<i64: 1, 128>}, {pipeline_mode = #tpu.pipeline_mode<synchronous>, transform_indices = @transform_5, window_bounds = array<i64: 128, 128>}, {pipeline_mode = #tpu.pipeline_mode<synchronous>, transform_indices = @transform_6, window_bounds = array<i64: 1, 128>}, {pipeline_mode = #tpu.pipeline_mode<synchronous>, transform_indices = @transform_7, window_bounds = array<i64: 128, 128>}, {pipeline_mode = #tpu.pipeline_mode<synchronous>, transform_indices = @transform_8, window_bounds = array<i64: 1, 128>}, {pipeline_mode = #tpu.pipeline_mode<synchronous>, transform_indices = @transform_9, window_bounds = array<i64: 128, 128>}, {pipeline_mode = #tpu.pipeline_mode<synchronous>, transform_indices = @transform_10, window_bounds = array<i64: 1, 128>}, {transform_indices = @transform_11, window_bounds = array<i64: 16, 128>}]} {
    %c0_i32 = arith.constant 0 : i32
    %0 = arith.cmpi eq, %arg1, %c0_i32 : i32
    %1 = arith.extui %0 : i1 to i32
    %c0_i32_0 = arith.constant 0 : i32
    %2 = arith.cmpi ne, %1, %c0_i32_0 : i32
    scf.if %2 {
      %c0_9 = arith.constant 0 : index
      %c0_10 = arith.constant 0 : index
      %12 = vector.load %arg4[%c0_9, %c0_10] : memref<1x128xf32, #tpu.memory_space<vmem>>, vector<1x128xf32>
      %13 = vector.shape_cast %12 : vector<1x128xf32> to vector<1x128xf32>
      %14 = vector.broadcast %13 : vector<1x128xf32> to vector<16x128xf32>
      %c0_11 = arith.constant 0 : index
      %c0_12 = arith.constant 0 : index
      %15 = vector.load %arg14[%c0_11, %c0_12] : memref<16x128xf32, #tpu.memory_space<vmem>>, vector<16x128xf32>
      tpu.vector_store %arg14[%c0_11, %c0_12], %14 {strides = array<i32>} : memref<16x128xf32, #tpu.memory_space<vmem>>, vector<16x128xf32>,
    } else {
    }
    %c0 = arith.constant 0 : index
    %c0_1 = arith.constant 0 : index
    %3 = vector.load %arg14[%c0, %c0_1] : memref<16x128xf32, #tpu.memory_space<vmem>>, vector<16x128xf32>
    %c0_2 = arith.constant 0 : index
    %c0_3 = arith.constant 0 : index
    %4 = vector.load %arg2[%c0_2, %c0_3] : memref<16x512xf32, #tpu.memory_space<vmem>>, vector<16x512xf32>
    %c0_4 = arith.constant 0 : index
    %c0_5 = arith.constant 0 : index
    %5 = vector.load %arg3[%c0_4, %c0_5] : memref<512x128xf32, #tpu.memory_space<vmem>>, vector<512x128xf32>
    %cst = arith.constant dense<0.000000e+00> : vector<16x128xf32>
    %6 = tpu.matmul %4, %5, %cst {dimension_numbers = #tpu.dot_dimension_numbers<[1], [0], [0], [1], [0, 0, 1, 1], [], []>} : vector<16x512xf32>, vector<512x128xf32>, vector<16x128xf32> -> vector<16x128xf32>
    %7 = arith.addf %3, %6 : vector<16x128xf32>
    %c0_6 = arith.constant 0 : index
    %c0_7 = arith.constant 0 : index
    %8 = vector.load %arg14[%c0_6, %c0_7] : memref<16x128xf32, #tpu.memory_space<vmem>>, vector<16x128xf32>
    tpu.vector_store %arg14[%c0_6, %c0_7], %7 {strides = array<i32>} : memref<16x128xf32, #tpu.memory_space<vmem>>, vector<16x128xf32>,
    %c1_i32 = arith.constant 1 : i32
    %9 = arith.cmpi eq, %arg1, %c1_i32 : i32
    %10 = arith.extui %9 : i1 to i32
    %c0_i32_8 = arith.constant 0 : i32
    %11 = arith.cmpi ne, %10, %c0_i32_8 : i32
    scf.if %11 {
      %c0_9 = arith.constant 0 : index
      %c0_10 = arith.constant 0 : index
      %12 = vector.load %arg14[%c0_9, %c0_10] : memref<16x128xf32, #tpu.memory_space<vmem>>, vector<16x128xf32>
      %13 = tpu.iota {dimensions = array<i32: 1>} : vector<16x128xi32>
      %c50_i32 = arith.constant 50 : i32
      %14 = vector.broadcast %c50_i32 : i32 to vector<16x128xi32>
      %15 = arith.cmpi slt, %13, %14 : vector<16x128xi32>
      %16 = arith.extui %15 : vector<16x128xi1> to vector<16x128xi32>
      %17 = arith.sitofp %16 : vector<16x128xi32> to vector<16x128xf32>
      %cst_11 = arith.constant dense<0.000000e+00> : vector<16xf32>
      %18 = vector.multi_reduction <add>, %12, %cst_11 [1] : vector<16x128xf32> to vector<16xf32>
      %19 = vector.shape_cast %18 : vector<16xf32> to vector<16x1xf32>
      %cst_12 = arith.constant 2.000000e-02 : f32
      %20 = vector.broadcast %cst_12 : f32 to vector<16x1xf32>
      %21 = arith.mulf %19, %20 : vector<16x1xf32>
      %22 = vector.broadcast %21 : vector<16x1xf32> to vector<16x128xf32>
      %23 = arith.subf %12, %22 : vector<16x128xf32>
      %24 = arith.mulf %23, %17 : vector<16x128xf32>
      %25 = arith.mulf %24, %24 : vector<16x128xf32>
      %cst_13 = arith.constant dense<0.000000e+00> : vector<16xf32>
      %26 = vector.multi_reduction <add>, %25, %cst_13 [1] : vector<16x128xf32> to vector<16xf32>
      %27 = vector.shape_cast %26 : vector<16xf32> to vector<16x1xf32>
      %cst_14 = arith.constant 2.000000e-02 : f32
      %28 = vector.broadcast %cst_14 : f32 to vector<16x1xf32>
      %29 = arith.mulf %27, %28 : vector<16x1xf32>
      %30 = vector.broadcast %21 : vector<16x1xf32> to vector<16x128xf32>
      %31 = arith.subf %12, %30 : vector<16x128xf32>
      %cst_15 = arith.constant 9.99999974E-6 : f32
      %32 = vector.broadcast %cst_15 : f32 to vector<16x1xf32>
      %33 = arith.addf %29, %32 : vector<16x1xf32>
      %34 = math.rsqrt %33 : vector<16x1xf32>
      %35 = vector.broadcast %34 : vector<16x1xf32> to vector<16x128xf32>
      %36 = arith.mulf %31, %35 : vector<16x128xf32>
      %c0_16 = arith.constant 0 : index
      %c0_17 = arith.constant 0 : index
      %37 = vector.load %arg5[%c0_16, %c0_17] : memref<1x128xf32, #tpu.memory_space<vmem>>, vector<1x128xf32>
      %38 = vector.broadcast %37 : vector<1x128xf32> to vector<16x128xf32>
      %39 = arith.mulf %36, %38 : vector<16x128xf32>
      %c0_18 = arith.constant 0 : index
      %c0_19 = arith.constant 0 : index
      %40 = vector.load %arg6[%c0_18, %c0_19] : memref<1x128xf32, #tpu.memory_space<vmem>>, vector<1x128xf32>
      %41 = vector.broadcast %40 : vector<1x128xf32> to vector<16x128xf32>
      %42 = arith.addf %39, %41 : vector<16x128xf32>
      %43 = math.tanh %42 : vector<16x128xf32>
      %c0_20 = arith.constant 0 : index
      %c0_21 = arith.constant 0 : index
      %44 = vector.load %arg7[%c0_20, %c0_21] : memref<128x128xf32, #tpu.memory_space<vmem>>, vector<128x128xf32>
      %cst_22 = arith.constant dense<0.000000e+00> : vector<16x128xf32>
      %45 = tpu.matmul %43, %44, %cst_22 {dimension_numbers = #tpu.dot_dimension_numbers<[1], [0], [0], [1], [0, 0, 1, 1], [], []>} : vector<16x128xf32>, vector<128x128xf32>, vector<16x128xf32> -> vector<16x128xf32>
      %c0_23 = arith.constant 0 : index
      %c0_24 = arith.constant 0 : index
      %46 = vector.load %arg8[%c0_23, %c0_24] : memref<1x128xf32, #tpu.memory_space<vmem>>, vector<1x128xf32>
      %47 = vector.broadcast %46 : vector<1x128xf32> to vector<16x128xf32>
      %48 = arith.addf %45, %47 : vector<16x128xf32>
      %cst_25 = arith.constant 0.000000e+00 : f32
      %49 = vector.broadcast %cst_25 : f32 to vector<16x128xf32>
      %50 = arith.maximumf %48, %49 : vector<16x128xf32>
      %c0_26 = arith.constant 0 : index
      %c0_27 = arith.constant 0 : index
      %51 = vector.load %arg9[%c0_26, %c0_27] : memref<128x128xf32, #tpu.memory_space<vmem>>, vector<128x128xf32>
      %cst_28 = arith.constant dense<0.000000e+00> : vector<16x128xf32>
      %52 = tpu.matmul %50, %51, %cst_28 {dimension_numbers = #tpu.dot_dimension_numbers<[1], [0], [0], [1], [0, 0, 1, 1], [], []>} : vector<16x128xf32>, vector<128x128xf32>, vector<16x128xf32> -> vector<16x128xf32>
      %c0_29 = arith.constant 0 : index
      %c0_30 = arith.constant 0 : index
      %53 = vector.load %arg10[%c0_29, %c0_30] : memref<1x128xf32, #tpu.memory_space<vmem>>, vector<1x128xf32>
      %54 = vector.broadcast %53 : vector<1x128xf32> to vector<16x128xf32>
      %55 = arith.addf %52, %54 : vector<16x128xf32>
      %cst_31 = arith.constant 0.000000e+00 : f32
      %56 = vector.broadcast %cst_31 : f32 to vector<16x128xf32>
      %57 = arith.maximumf %55, %56 : vector<16x128xf32>
      %c0_32 = arith.constant 0 : index
      %c0_33 = arith.constant 0 : index
      %58 = vector.load %arg11[%c0_32, %c0_33] : memref<128x128xf32, #tpu.memory_space<vmem>>, vector<128x128xf32>
      %cst_34 = arith.constant dense<0.000000e+00> : vector<16x128xf32>
      %59 = tpu.matmul %57, %58, %cst_34 {dimension_numbers = #tpu.dot_dimension_numbers<[1], [0], [0], [1], [0, 0, 1, 1], [], []>} : vector<16x128xf32>, vector<128x128xf32>, vector<16x128xf32> -> vector<16x128xf32>
      %c0_35 = arith.constant 0 : index
      %c0_36 = arith.constant 0 : index
      %60 = vector.load %arg12[%c0_35, %c0_36] : memref<1x128xf32, #tpu.memory_space<vmem>>, vector<1x128xf32>
      %61 = vector.broadcast %60 : vector<1x128xf32> to vector<16x128xf32>
      %62 = arith.addf %59, %61 : vector<16x128xf32>
      %63 = math.tanh %62 : vector<16x128xf32>
      %c0_37 = arith.constant 0 : index
      %c0_38 = arith.constant 0 : index
      %64 = vector.load %arg13[%c0_37, %c0_38] : memref<16x128xf32, #tpu.memory_space<vmem>>, vector<16x128xf32>
      tpu.vector_store %arg13[%c0_37, %c0_38], %63 {strides = array<i32>} : memref<16x128xf32, #tpu.memory_space<vmem>>, vector<16x128xf32>,
    } else {
    }
    return
  }
  func.func @transform_0(%arg0: i32, %arg1: i32) -> (i32, i32) {
    %c0_i32 = arith.constant 0 : i32
    return %arg0, %arg1 : i32, i32
  }
  func.func @transform_1(%arg0: i32, %arg1: i32) -> (i32, i32) {
    %c0_i32 = arith.constant 0 : i32
    %c0_i32_0 = arith.constant 0 : i32
    return %arg1, %c0_i32 : i32, i32
  }
  func.func @transform_2(%arg0: i32, %arg1: i32) -> (i32, i32) {
    %c0_i32 = arith.constant 0 : i32
    %c0_i32_0 = arith.constant 0 : i32
    %c0_i32_1 = arith.constant 0 : i32
    return %c0_i32, %c0_i32_0 : i32, i32
  }
  func.func @transform_3(%arg0: i32, %arg1: i32) -> (i32, i32) {
    %c0_i32 = arith.constant 0 : i32
    %c0_i32_0 = arith.constant 0 : i32
    %c0_i32_1 = arith.constant 0 : i32
    return %c0_i32, %c0_i32_0 : i32, i32
  }
  func.func @transform_4(%arg0: i32, %arg1: i32) -> (i32, i32) {
    %c0_i32 = arith.constant 0 : i32
    %c0_i32_0 = arith.constant 0 : i32
    %c0_i32_1 = arith.constant 0 : i32
    return %c0_i32, %c0_i32_0 : i32, i32
  }
  func.func @transform_5(%arg0: i32, %arg1: i32) -> (i32, i32) {
    %c0_i32 = arith.constant 0 : i32
    %c0_i32_0 = arith.constant 0 : i32
    %c0_i32_1 = arith.constant 0 : i32
    return %c0_i32, %c0_i32_0 : i32, i32
  }
  func.func @transform_6(%arg0: i32, %arg1: i32) -> (i32, i32) {
    %c0_i32 = arith.constant 0 : i32
    %c0_i32_0 = arith.constant 0 : i32
    %c0_i32_1 = arith.constant 0 : i32
    return %c0_i32, %c0_i32_0 : i32, i32
  }
  func.func @transform_7(%arg0: i32, %arg1: i32) -> (i32, i32) {
    %c0_i32 = arith.constant 0 : i32
    %c0_i32_0 = arith.constant 0 : i32
    %c0_i32_1 = arith.constant 0 : i32
    return %c0_i32, %c0_i32_0 : i32, i32
  }
  func.func @transform_8(%arg0: i32, %arg1: i32) -> (i32, i32) {
    %c0_i32 = arith.constant 0 : i32
    %c0_i32_0 = arith.constant 0 : i32
    %c0_i32_1 = arith.constant 0 : i32
    return %c0_i32, %c0_i32_0 : i32, i32
  }
  func.func @transform_9(%arg0: i32, %arg1: i32) -> (i32, i32) {
    %c0_i32 = arith.constant 0 : i32
    %c0_i32_0 = arith.constant 0 : i32
    %c0_i32_1 = arith.constant 0 : i32
    return %c0_i32, %c0_i32_0 : i32, i32
  }
  func.func @transform_10(%arg0: i32, %arg1: i32) -> (i32, i32) {
    %c0_i32 = arith.constant 0 : i32
    %c0_i32_0 = arith.constant 0 : i32
    %c0_i32_1 = arith.constant 0 : i32
    return %c0_i32, %c0_i32_0 : i32, i32
  }
  func.func @transform_11(%arg0: i32, %arg1: i32) -> (i32, i32) {
    %c0_i32 = arith.constant 0 : i32
    %c0_i32_0 = arith.constant 0 : i32
    return %arg0, %c0_i32 : i32, i32
  }
}

</mosaic_0001>

<bundles_post_ra>
// kernel: tpu_custom_call.1
= control target key start
LH: loop header
LB: loop body
LE: loop exit
PB: predicated region body
PF: predicated region fallthrough
CT: control target
= control target key end

     0   :  { %s2207_s0 = inlined_call_operand.hbm [shape: f32[16,1024], index: 0, kind: input, shape index: {}]   ;;  %s2208_s1 = inlined_call_operand.hbm [shape: f32[1024,128], index: 1, kind: input, shape index: {}]   ;;  %s2209_s2 = inlined_call_operand.vmem [shape: f32[1,128], index: 2, kind: input, shape index: {}]   ;;  %s2210_s3 = inlined_call_operand.vmem [shape: f32[1,128], index: 3, kind: input, shape index: {}]   ;;  %s2211_s4 = inlined_call_operand.vmem [shape: f32[1,128], index: 4, kind: input, shape index: {}]   ;;  %s2212_s5 = inlined_call_operand.hbm [shape: f32[128,128], index: 5, kind: input, shape index: {}]   ;;  %s2213_s6 = inlined_call_operand.vmem [shape: f32[1,128], index: 6, kind: input, shape index: {}]   ;;  %s2214_s7 = inlined_call_operand.hbm [shape: f32[128,128], index: 7, kind: input, shape index: {}]   ;;  %s2215_s8 = inlined_call_operand.vmem [shape: f32[1,128], index: 8, kind: input, shape index: {}]   ;;  %s2216_s9 = inlined_call_operand.hbm [shape: f32[128,128], index: 9, kind: input, shape index: {}]   ;;  %s2217_s10 = inlined_call_operand.vmem [shape: f32[1,128], index: 10, kind: input, shape index: {}]   ;;  %s2218_s11 = inlined_call_operand.hbm [shape: f32[16,128], index: 11, kind: output, shape index: {}]  }
   0x1   :  { %2225 = sst [smem:[#allocation22_spill]] %s2207_s0 }
   0x2   :  { %2226 = sst [smem:[#allocation23_spill]] %s2212_s5 }
   0x3   :  { %2227 = sst [smem:[#allocation24_spill]] %s2214_s7 }
   0x4   :  { %2228 = sst [smem:[#allocation25_spill]] %s2215_s8 }
   0x5   :  { %2229 = sst [smem:[#allocation26_spill]] %s2216_s9 }
   0x6   :  { %2230 = sst [smem:[#allocation27_spill]] %s2217_s10 }
   0x7   :  { %2231 = sst [smem:[#allocation28_spill]] %s2218_s11 }
   0x8   :  { %16 = vsyncpa [#allocation4], 0 }
   0x9   :  { %18 = vsyncpa [#allocation4 + $0x1], 0 }
   0xa   :  { %19 = vsyncpa [#allocation7], 0 }
   0xb   :  { %21 = vsyncpa [#allocation7 + $0x1], 0 }
   0xc   :  { %22 = vsyncpa [#allocation10], 0 }
   0xd   :  { %23 = vsyncpa [#allocation5], 0  ;;  %s1913_s17 = smov 0   ;;  %s1915_s18 = smov 0  }
   0xe   :  { %s1917_s19 = smov 0   ;;  %s1919_s20 = smov 0  }
   0xf   :  { %s1921_s21 = smov 0   ;;  %s1923_s22 = smov 0  }
  0x10 LB: > { %2232 = sst [smem:[#allocation18_spill]] %s1825_s19  ;;  %s1942_s23 = sadd.s32 4294967295, %s1837_s22   ;;  %s1837_s22 = sphi %s1923_s22, %s29_s22   ;;  %s1833_s21 = sphi %s1921_s21, %s2261_s21   ;;  %s1829_s20 = sphi %s1919_s20, %s2260_s20   ;;  %s1825_s19 = sphi %s1917_s19, %s2256_s19   ;;  %s1821_s18 = sphi %s1915_s18, %s2259_s18   ;;  %s1817_s17 = sphi %s1913_s17, %s2258_s17  }
  0x11   : > { %2233 = sst [smem:[#allocation19_spill]] %s1837_s22  ;;  %p57_p0 = scmp.ne.s32.totalorder %s1825_s19, %s1821_s18 }
  0x12   : > { %p58_p1 = scmp.eq.s32.totalorder %s1837_s22, 0  ;;  %p63_p2 = scmp.ne.s32.totalorder %s1821_s18, %s1817_s17 }
  0x13   : > { %p2219_p3 = scmp.eq.s32.totalorder %s1942_s23, 0  ;;  %p1228_p5 = scmp.ge.s32.totalorder %s1837_s22, 1 }
  0x14   : > { %p59_p4 = por %p58_p1, %p57_p0  ;;  %p315_p7 = scmp.lt.s32.totalorder %s1837_s22, 3 }
  0x15   : > { %p1953_p6 = por %p2219_p3, %p63_p2  ;;  %s1839_s27 = smov [#allocation8]  }
  0x16   : > { %p1958_p8 = pnand %p1228_p5, %p315_p7  ;;  %s336_s28 = sshll.u32 %s1839_s27, 4  ;;  %s337_s28 = int_to_ptr.vmem [resolvable:$true] %s336_s28 }
  0x17   : > { %p1535_p10 = scmp.lt.s32.totalorder %s1837_s22, 2  ;;  %s1840_s12 = smov [#allocation9]  }
  0x18   : > { %p1515_p9 = pneg %p1958_p8  ;;  %s352_s13 = sshll.u32 %s1840_s12, 4  ;;  %s353_s13 = int_to_ptr.vmem [resolvable:$true] %s352_s13 }
  0x19   : > { %p1971_p12 = pnand %p1535_p10, %p59_p4  ;;  %s1624_s14 = scalar_lea.vmem %s337_s28, 2048 }
  0x1a   : > { %p1967_p11 = pnand %p1515_p9, %p2219_p3  ;;  %p1625_p0 = scmp.ne.s32.totalorder %s337_s28, %s1624_s14 }
  0x1b   : > { %p1632_p5 = scmp.lt.s32.totalorder %s337_s28, %s337_s28  ;;  %p1633_p7 = scmp.lt.s32.totalorder %s1624_s14, %s1624_s14 }
  0x1c   : > { %p1615_p13 = pneg %p1967_p11 }
  0x1d   : > { %p1634_p9 = por %p1633_p7, %p1632_p5 }
  0x1e   : > { %p1627_p1 = pnand %p1625_p0, %p1615_p13 }
  0x20   : > { %p1628_p2 = pneg %p1627_p1 }
  0x22   : > { %p1635_p3 = pnand %p1634_p9, %p1628_p2 }
  0x24   : > { %1638 = shalt.err (!%p1635_p3)
}
  0x25   : > { %s2220_s15 = smov 128   ;;  %s2221_s16 = smov 8  }
  0x26   : > { %s2238_s5 = sld [smem:[#allocation23_spill]]  ;;  %s1650_s12 = scalar_lea.vmem %s353_s13, 2048 }
  0x27   : > { %p1651_p4 = scmp.ne.s32.totalorder %s353_s13, %s1650_s12  ;;  %p1658_p1 = scmp.lt.s32.totalorder %s353_s13, %s353_s13 }
  0x28   : > { %p1659_p3 = scmp.lt.s32.totalorder %s1650_s12, %s1650_s12 }
  0x29   : > { %p1653_p10 = pnand %p1651_p4, %p1615_p13 }
  0x2a   : > { %p1660_p2 = por %p1659_p3, %p1658_p1 }
  0x2b   : > { %p1654_p0 = pneg %p1653_p10 }
  0x2c   : > { %1518 = dma.hbm_to_vmem [thread:$0]  (!%p1967_p11), %s2238_s5, 2048, %s337_s28, [#allocation7], %s2220_s15, %s2220_s15, %s2221_s16  }
  0x2d   : > { %p1661_p5 = pnand %p1660_p2, %p1654_p0 }
  0x2f   : > { %1664 = shalt.err (!%p1661_p5)
}
  0x30   : > { %s2239_s7 = sld [smem:[#allocation24_spill]]  ;;  %s1843_s28 = smov [#allocation11]  }
  0x31   : > { %s368_s17 = sshll.u32 %s1843_s28, 4  ;;  %s369_s17 = int_to_ptr.vmem [resolvable:$true] %s368_s17 }
  0x32   : > { %s1676_s27 = scalar_lea.vmem %s369_s17, 2048  ;;  %p1684_p10 = scmp.lt.s32.totalorder %s369_s17, %s369_s17 }
  0x33   : > { %p1677_p7 = scmp.ne.s32.totalorder %s369_s17, %s1676_s27  ;;  %p1685_p0 = scmp.lt.s32.totalorder %s1676_s27, %s1676_s27 }
  0x35   : > { %p1679_p9 = pnand %p1677_p7, %p1615_p13  ;;  %p1686_p1 = por %p1685_p0, %p1684_p10 }
  0x36   : > { %1521 = dma.hbm_to_vmem [thread:$0]  (!%p1967_p11), %s2239_s7, 2048, %s353_s13, [#allocation10], %s2220_s15, %s2220_s15, %s2221_s16  }
  0x37   : > { %p1680_p4 = pneg %p1679_p9 }
  0x39   : > { %p1687_p3 = pnand %p1686_p1, %p1680_p4 }
  0x3b   : > { %1690 = shalt.err (!%p1687_p3)
}
  0x3c   : > { %s2240_s9 = sld [smem:[#allocation26_spill]]  ;;  %s38_s12 = sadd.s32 1, %s1833_s21 }
  0x3d   : > { %s2012_s14 = sand.u32 1, %s1825_s19   ;;  %p39_p13 = scmp.ge.s32.totalorder %s38_s12, 2 }
  0x3e   : > { %s1233_s29 = sshll.u32 %s2012_s14, 6  ;;  %s1258_s28 = sshll.u32 %s1833_s21, 9 }
  0x3f   : > { %s2263_s12 = smov (%p39_p13, %s38_s12), 0  ;;  %s2242_s0 = sld [smem:[#allocation22_spill]] }
  0x40   : > { %2241 = sst [smem:[#allocation20_spill]] %s2263_s12  ;;  %s46_s5 = ssub.s32 %s1833_s21, %s2263_s12 }
  0x41   : > { %s386_s11 = scalar_lea.sflag [#allocation4], %s2012_s14  ;;  %p1693_p2 = pneg %p1971_p12 }
  0x42   : > { %1524 = dma.hbm_to_vmem [thread:$0]  (!%p1967_p11), %s2240_s9, 2048, %s369_s17, [#allocation10], %s2220_s15, %s2220_s15, %s2221_s16  }
  0x43   : > { %s389_s17 = scalar_lea.vmem [#allocation3], %s1233_s29  ;;  %p48_p11 = scmp.eq.s32.totalorder %s46_s5, 0 }
  0x44   : > { %s399_s15 = sshll.u32 %s389_s17, 4  ;;  %s2243_s16 = sadd.s32 1, %s1825_s19  ;;  %s400_s15 = int_to_ptr.vmem [resolvable:$true] %s399_s15 }
  0x45   : > { %s2021_s13 = scalar_lea.hbm %s2242_s0, %s1258_s28  ;;  %s409_s9 = sand.u32 1, %s1837_s22  }
  0x46   : > { %s2028_s7 = scalar_select %p48_p11, %s1825_s19, %s2243_s16  }
  0x47   : > { %s1704_s10 = scalar_lea.vmem %s400_s15, 1024  ;;  %s1844_s28 = smov [#allocation3]  }
  0x48   : > { %2244 = sst [smem:[#allocation21_spill]] %s2028_s7  ;;  %p1705_p5 = scmp.ne.s32.totalorder %s400_s15, %s1704_s10 }
  0x49   : > { %s1709_s27 = sshll.u32 %s1844_s28, 4  ;;  %s1710_s27 = int_to_ptr.vmem [resolvable:$false] %s1709_s27 }
  0x4a   : > { %p1707_p7 = pnand %p1705_p5, %p1693_p2  ;;  %s1711_s29 = scalar_lea.vmem %s1710_s27, 2048 }
  0x4b   : > { %p1712_p4 = scmp.lt.s32.totalorder %s400_s15, %s1710_s27  ;;  %p1713_p10 = scmp.lt.s32.totalorder %s1711_s29, %s1704_s10 }
  0x4c   : > { %p1708_p9 = pneg %p1707_p7 }
  0x4d   : > { %p1714_p0 = por %p1713_p10, %p1712_p4 }
  0x4f   : > { %p1715_p1 = pnand %p1714_p0, %p1708_p9 }
  0x51   : > { %1718 = shalt.err (!%p1715_p1)
}
  0x52   : > { %s1845_s5 = smov 1024   ;;  %s1846_s16 = smov 512  }
  0x53   : > { %s1847_s24 = smov 32   ;;  %s1236_s17 = sshll.u32 %s2012_s14, 9 }
  0x54   : > { %1528 = dma.hbm_to_vmem [thread:$0]  (!%p1971_p12), %s2021_s13, 1024, %s400_s15, %s386_s11, %s1845_s5, %s1846_s16, %s1847_s24  }
  0x55   : > { %s1259_s0 = sshll.u32 %s1833_s21, 13  ;;  %s413_s10 = scalar_lea.vmem [#allocation6], %s1236_s17 }
  0x56   : > { %s419_s27 = scalar_lea.hbm %s2208_s1, %s1259_s0  ;;  %s420_s29 = sshll.u32 %s413_s10, 4  ;;  %s421_s29 = int_to_ptr.vmem [resolvable:$true] %s420_s29 }
  0x57   : > { %s410_s7 = scalar_lea.sflag [#allocation7], %s409_s9  ;;  %s1732_s19 = scalar_lea.vmem %s421_s29, 8192 }
  0x58   : > { %p1733_p3 = scmp.ne.s32.totalorder %s421_s29, %s1732_s19  ;;  %s1848_s22 = smov [#allocation6]  }
  0x59   : > { %s1737_s8 = sshll.u32 %s1848_s22, 4  ;;  %s1738_s8 = int_to_ptr.vmem [resolvable:$false] %s1737_s8 }
  0x5a   : > { %p1735_p13 = pnand %p1733_p3, %p1693_p2  ;;  %s1739_s11 = scalar_lea.vmem %s1738_s8, 16384 }
  0x5b   : > { %p1740_p5 = scmp.lt.s32.totalorder %s421_s29, %s1738_s8  ;;  %p1741_p7 = scmp.lt.s32.totalorder %s1739_s11, %s1732_s19 }
  0x5c   : > { %p1736_p11 = pneg %p1735_p13 }
  0x5d   : > { %p1742_p9 = por %p1741_p7, %p1740_p5 }
  0x5f   : > { %p1743_p4 = pnand %p1742_p9, %p1736_p11 }
  0x61   : > { %1746 = shalt.err (!%p1743_p4)
}
  0x62   : > { %s2245_s0 = smov 8   ;;  %s2246_s15 = smov 128  }
  0x63   : > { %1531 = dma.hbm_to_vmem [thread:$0]  (!%p1971_p12), %s419_s27, 8192, %s421_s29, %s410_s7, %s2246_s15, %s2246_s15, %s2245_s0  }
  0x64   : > { %432 = sbr.rel (%p1958_p8) target bundleno = 1329 (0x531), region = 64  ;;  %s434_s9 = sand.u32 (!%p1958_p8), 1, %s1821_s18  }
  0x65   : > { %s1240_s22 = sshll.u32 (!%p1958_p8), %s434_s9, 6  ;;  %s435_s12 = scalar_lea.sflag (!%p1958_p8), [#allocation4], %s434_s9 }
  0x66   : > { %s2056_s14 = scalar_lea.vmem (!%p1958_p8), [#allocation3], %s1240_s22 }
  0x69   : > { %1796 = dma.done.wait (%p1953_p6), %s435_s12, 1024  }
  0x6a   : > { %1798 = vsyncadd (%p1953_p6), %s435_s12, 4294966272  ;;  %s443_s8 = sand.u32 1, %s1942_s23   ;;  %s1241_s19 = sshll.u32 %s434_s9, 9 }
  0x6b   : > { %s444_s7 = scalar_lea.sflag [#allocation7], %s443_s8  ;;  %s2063_s30 = scalar_lea.vmem [#allocation6], %s1241_s19 }
  0x6c   : > { %1800 = dma.done.wait (%p1953_p6), %s444_s7, 8192  }
  0x6d   : > { %1802 = vsyncadd (%p1953_p6), %s444_s7, 4294959104  ;;  %p2247_p8 = scmp.eq.s32.totalorder %s1942_s23, 0 }
  0x6f   : > { %1804 = dma.done.wait (%p2247_p8), [#allocation7], 2048   ;;  %p2248_p12 = pmov %p2247_p8 }
  0x70   : > { %p2249_p2 = pmov %p2247_p8 }
  0x71   : > { %1806 = vsyncadd (%p2248_p12), [#allocation7], 4294965248 }
  0x72   : > { %1808 = dma.done.wait (%p2249_p2), [#allocation10], 4096   ;;  %p2250_p10 = pmov %p2249_p2 }
  0x73   : > { %p1245_p0 = scmp.ne.s32.totalorder %s1829_s20, 0 }
  0x74   : > { %1810 = vsyncadd (%p2250_p10), [#allocation10], 4294963200 }
  0x75   : > { %505 = sbr.rel (%p1245_p0) target bundleno = 124 (0x7c), region = 88 }
  0x7a   : > { %v1246_v0 = vld [vmem:[%s2209_s2] ss:$0 sm:$0xff] }
  0x7b   : > { %513 = vst [vmem:[#allocation2] sm:$0xff] %v1246_v0  ;;  %514 = vst [vmem:[#allocation2 + $0x8] sm:$0xff] %v1246_v0 }
  0x7c PF: > { %v556_v1 = vld [vmem:[%s2063_s30 + $0xf8] sm:$0xff]  ;;  %v555_v5 = vld [vmem:[%s2063_s30 + $0xf0] sm:$0xff]  ;;  %v554_v9 = vld [vmem:[%s2063_s30 + $0xe8] sm:$0xff]  ;;  %p1247_p6 = scmp.ne.s32.totalorder %s1829_s20, 1 }
  0x7d   : > { %v588_v2 = vld [vmem:[%s2063_s30 + $0x1f8] sm:$0xff]  ;;  %1260 = vmatprep.subr.mxu0 %v556_v1  ;;  %v587_v6 = vld [vmem:[%s2063_s30 + $0x1f0] sm:$0xff]  ;;  %v586_v10 = vld [vmem:[%s2063_s30 + $0x1e8] sm:$0xff]  ;;  %s2251_s10 = sld [smem:[#allocation25_spill]] (!%p1247_p6) }
  0x7e   : > { %v540_v3 = vld [vmem:[%s2063_s30 + $0x78] sm:$0xff]  ;;  %1298 = vmatprep.subr.mxu1 %v588_v2  ;;  %v539_v7 = vld [vmem:[%s2063_s30 + $0x70] sm:$0xff]  ;;  %v538_v11 = vld [vmem:[%s2063_s30 + $0x68] sm:$0xff]  ;;  %s2252_s0 = sld [smem:[#allocation27_spill]] (!%p1247_p6) }
  0x7f   : > { %v572_v4 = vld [vmem:[%s2063_s30 + $0x178] sm:$0xff]  ;;  %1261 = vmatpush3.msra.mxu0 %v540_v3  ;;  %v571_v8 = vld [vmem:[%s2063_s30 + $0x170] sm:$0xff]  ;;  %v570_v12 = vld [vmem:[%s2063_s30 + $0x168] sm:$0xff] }
  0x80   : > { %1299 = vmatpush3.msra.mxu1 %v572_v4  ;;  %1262 = vmatprep.subr.mxu0 %v555_v5  ;;  %v553_v13 = vld [vmem:[%s2063_s30 + $0xe0] sm:$0xff]  ;;  %v552_v17 = vld [vmem:[%s2063_s30 + $0xd8] sm:$0xff]  ;;  %v551_v21 = vld [vmem:[%s2063_s30 + $0xd0] sm:$0xff] }
  0x81   : > { %1300 = vmatprep.subr.mxu1 %v587_v6  ;;  %1263 = vmatpush3.msra.mxu0 %v539_v7  ;;  %v585_v14 = vld [vmem:[%s2063_s30 + $0x1e0] sm:$0xff]  ;;  %v584_v18 = vld [vmem:[%s2063_s30 + $0x1d8] sm:$0xff]  ;;  %v583_v22 = vld [vmem:[%s2063_s30 + $0x1d0] sm:$0xff] }
  0x82   : > { %1301 = vmatpush3.msra.mxu1 %v571_v8  ;;  %1264 = vmatprep.subr.mxu0 %v554_v9  ;;  %v537_v15 = vld [vmem:[%s2063_s30 + $0x60] sm:$0xff]  ;;  %v536_v19 = vld [vmem:[%s2063_s30 + $0x58] sm:$0xff]  ;;  %v535_v23 = vld [vmem:[%s2063_s30 + $0x50] sm:$0xff] }
  0x83   : > { %1302 = vmatprep.subr.mxu1 %v586_v10  ;;  %v569_v16 = vld [vmem:[%s2063_s30 + $0x160] sm:$0xff]  ;;  %1265 = vmatpush3.msra.mxu0 %v538_v11  ;;  %v568_v20 = vld [vmem:[%s2063_s30 + $0x158] sm:$0xff]  ;;  %v567_v24 = vld [vmem:[%s2063_s30 + $0x150] sm:$0xff] }
  0x84   : > { %1303 = vmatpush3.msra.mxu1 %v570_v12  ;;  %1266 = vmatprep.subr.mxu0 %v553_v13  ;;  %v550_v25 = vld [vmem:[%s2063_s30 + $0xc8] sm:$0xff]  ;;  %v549_v29 = vld [vmem:[%s2063_s30 + $0xc0] sm:$0xff]  ;;  %v548_v33 = vld [vmem:[%s2063_s30 + $0xb8] sm:$0xff] }
  0x85   : > { %1304 = vmatprep.subr.mxu1 %v585_v14  ;;  %1267 = vmatpush3.msra.mxu0 %v537_v15  ;;  %v582_v26 = vld [vmem:[%s2063_s30 + $0x1c8] sm:$0xff]  ;;  %v581_v30 = vld [vmem:[%s2063_s30 + $0x1c0] sm:$0xff]  ;;  %v580_v34 = vld [vmem:[%s2063_s30 + $0x1b8] sm:$0xff] }
  0x86   : > { %1305 = vmatpush3.msra.mxu1 %v569_v16  ;;  %1268 = vmatprep.subr.mxu0 %v552_v17  ;;  %v534_v27 = vld [vmem:[%s2063_s30 + $0x48] sm:$0xff]  ;;  %v533_v31 = vld [vmem:[%s2063_s30 + $0x40] sm:$0xff]  ;;  %v532_v35 = vld [vmem:[%s2063_s30 + $0x38] sm:$0xff] }
  0x87   : > { %1306 = vmatprep.subr.mxu1 %v584_v18  ;;  %1269 = vmatpush3.msra.mxu0 %v536_v19  ;;  %v566_v28 = vld [vmem:[%s2063_s30 + $0x148] sm:$0xff]  ;;  %v565_v32 = vld [vmem:[%s2063_s30 + $0x140] sm:$0xff]  ;;  %v564_v36 = vld [vmem:[%s2063_s30 + $0x138] sm:$0xff] }
  0x88   : > { %1307 = vmatpush3.msra.mxu1 %v568_v20  ;;  %1270 = vmatprep.subr.mxu0 %v551_v21  ;;  %v547_v37 = vld [vmem:[%s2063_s30 + $0xb0] sm:$0xff]  ;;  %v546_v41 = vld [vmem:[%s2063_s30 + $0xa8] sm:$0xff]  ;;  %v545_v45 = vld [vmem:[%s2063_s30 + $0xa0] sm:$0xff] }
  0x89   : > { %1308 = vmatprep.subr.mxu1 %v583_v22  ;;  %1271 = vmatpush3.msra.mxu0 %v535_v23  ;;  %v579_v38 = vld [vmem:[%s2063_s30 + $0x1b0] sm:$0xff]  ;;  %v578_v42 = vld [vmem:[%s2063_s30 + $0x1a8] sm:$0xff]  ;;  %v577_v46 = vld [vmem:[%s2063_s30 + $0x1a0] sm:$0xff] }
  0x8a   : > { %1309 = vmatpush3.msra.mxu1 %v567_v24  ;;  %1272 = vmatprep.subr.mxu0 %v550_v25  ;;  %v531_v39 = vld [vmem:[%s2063_s30 + $0x30] sm:$0xff]  ;;  %v530_v43 = vld [vmem:[%s2063_s30 + $0x28] sm:$0xff]  ;;  %v529_v47 = vld [vmem:[%s2063_s30 + $0x20] sm:$0xff] }
  0x8b   : > { %1310 = vmatprep.subr.mxu1 %v582_v26  ;;  %1273 = vmatpush3.msra.mxu0 %v534_v27  ;;  %v563_v40 = vld [vmem:[%s2063_s30 + $0x130] sm:$0xff]  ;;  %v562_v44 = vld [vmem:[%s2063_s30 + $0x128] sm:$0xff]  ;;  %v561_v48 = vld [vmem:[%s2063_s30 + $0x120] sm:$0xff] }
  0x8c   : > { %1311 = vmatpush3.msra.mxu1 %v566_v28  ;;  %1274 = vmatprep.subr.mxu0 %v549_v29  ;;  %v544_v49 = vld [vmem:[%s2063_s30 + $0x98] sm:$0xff]  ;;  %v543_v53 = vld [vmem:[%s2063_s30 + $0x90] sm:$0xff]  ;;  %v542_v57 = vld [vmem:[%s2063_s30 + $0x88] sm:$0xff] }
  0x8d   : > { %1312 = vmatprep.subr.mxu1 %v581_v30  ;;  %1275 = vmatpush3.msra.mxu0 %v533_v31  ;;  %v576_v50 = vld [vmem:[%s2063_s30 + $0x198] sm:$0xff]  ;;  %v575_v54 = vld [vmem:[%s2063_s30 + $0x190] sm:$0xff]  ;;  %v574_v58 = vld [vmem:[%s2063_s30 + $0x188] sm:$0xff] }
  0x8e   : > { %1313 = vmatpush3.msra.mxu1 %v565_v32  ;;  %1276 = vmatprep.subr.mxu0 %v548_v33  ;;  %v528_v51 = vld [vmem:[%s2063_s30 + $0x18] sm:$0xff]  ;;  %v527_v55 = vld [vmem:[%s2063_s30 + $0x10] sm:$0xff]  ;;  %v526_v59 = vld [vmem:[%s2063_s30 + $0x8] sm:$0xff] }
  0x8f   : > { %1314 = vmatprep.subr.mxu1 %v580_v34  ;;  %1277 = vmatpush3.msra.mxu0 %v532_v35  ;;  %v560_v52 = vld [vmem:[%s2063_s30 + $0x118] sm:$0xff]  ;;  %v559_v56 = vld [vmem:[%s2063_s30 + $0x110] sm:$0xff]  ;;  %v558_v60 = vld [vmem:[%s2063_s30 + $0x108] sm:$0xff] }
  0x90   : > { %1315 = vmatpush3.msra.mxu1 %v564_v36  ;;  %1278 = vmatprep.subr.mxu0 %v547_v37  ;;  %v541_v61 = vld [vmem:[%s2063_s30 + $0x80] sm:$0xff]  ;;  %v518_v0 = vld [vmem:[%s2056_s14 + $0x8] sm:$0xff]  ;;  %v520_v2 = vld [vmem:[%s2056_s14 + $0x18] sm:$0xff] }
  0x91   : > { %1316 = vmatprep.subr.mxu1 %v579_v38  ;;  %1279 = vmatpush3.msra.mxu0 %v531_v39  ;;  %v573_v62 = vld [vmem:[%s2063_s30 + $0x180] sm:$0xff]  ;;  %v519_v4 = vld [vmem:[%s2056_s14 + $0x10] sm:$0xff]  ;;  %v522_v5 = vld [vmem:[%s2056_s14 + $0x28] sm:$0xff] }
  0x92   : > { %1317 = vmatpush3.msra.mxu1 %v563_v40  ;;  %1280 = vmatprep.subr.mxu0 %v546_v41  ;;  %v525_v63 = vld [vmem:[%s2063_s30] sm:$0xff]  ;;  %v524_v6 = vld [vmem:[%s2056_s14 + $0x38] sm:$0xff]  ;;  %v523_v8 = vld [vmem:[%s2056_s14 + $0x30] sm:$0xff] }
  0x93   : > { %1318 = vmatprep.subr.mxu1 %v578_v42  ;;  %1281 = vmatpush3.msra.mxu0 %v530_v43  ;;  %v557_v1 = vld [vmem:[%s2063_s30 + $0x100] sm:$0xff]  ;;  %v515_v15 = vld [vmem:[#allocation2] sm:$0xff]  ;;  %v516_v24 = vld [vmem:[#allocation2 + $0x8] sm:$0xff] }
  0x94   : > { %1319 = vmatpush3.msra.mxu1 %v562_v44  ;;  %1282 = vmatprep.subr.mxu0 %v545_v45  ;;  %v517_v3 = vld [vmem:[%s2056_s14] sm:$0xff] }
  0x95   : > { %1320 = vmatprep.subr.mxu1 %v577_v46  ;;  %1283 = vmatpush3.msra.mxu0 %v529_v47  ;;  %v521_v7 = vld [vmem:[%s2056_s14 + $0x20] sm:$0xff] }
  0x96   : > { %1321 = vmatpush3.msra.mxu1 %v561_v48  ;;  %1284 = vmatprep.subr.mxu0 %v544_v49 }
  0x97   : > { %1322 = vmatprep.subr.mxu1 %v576_v50  ;;  %1285 = vmatpush3.msra.mxu0 %v528_v51 }
  0x98   : > { %1323 = vmatpush3.msra.mxu1 %v560_v52  ;;  %1286 = vmatprep.subr.mxu0 %v543_v53 }
  0x99   : > { %1324 = vmatprep.subr.mxu1 %v575_v54  ;;  %1287 = vmatpush3.msra.mxu0 %v527_v55 }
  0x9a   : > { %1325 = vmatpush3.msra.mxu1 %v559_v56  ;;  %1288 = vmatprep.subr.mxu0 %v542_v57 }
  0x9b   : > { %1326 = vmatprep.subr.mxu1 %v574_v58  ;;  %1289 = vmatpush3.msra.mxu0 %v526_v59 }
  0x9c   : > { %1327 = vmatpush3.msra.mxu1 %v558_v60  ;;  %1290 = vmatprep.subr.mxu0 %v541_v61 }
  0x9d   : > { %1328 = vmatprep.subr.mxu1 %v573_v62  ;;  %1291 = vmatpush3.msra.mxu0 %v525_v63 }
  0x9e   : > { %653 = vmatprep.mubr.f32.mxu0 %v518_v0  ;;  %1329 = vmatpush3.msra.mxu1 %v557_v1 }
  0x9f   : > { %728 = vmatprep.mubr.f32.mxu1 %v520_v2  ;;  %654 = vmatmul.mubr.f32.vlgmr.msra.gmra.mxu0 %v517_v3 }
  0xa0   : > { %729 = vmatmul.mubr.f32.vlgmr.msra.gmra.mxu1 %v519_v4  ;;  %658 = vmatprep.mubr.f32.mxu0 %v522_v5 }
  0xa1   : > { %733 = vmatprep.mubr.f32.mxu1 %v524_v6 }
  0xa3   : > { %659 = vmatmul.mubr.f32.gmra.mxu0 %v521_v7 }
  0xa4   : > { %734 = vmatmul.mubr.f32.gmra.mxu1 %v523_v8 }
 0x15f   : > { %v1292_v9 = vpop.f32.mrf.mxu0 }
 0x160   : > { %v1330_v10 = vpop.f32.mrf.mxu1 }
 0x161   : > { %v1293_v11 = vpop.f32.mrf.mxu0 }
 0x162   : > { %v1331_v12 = vpop.f32.mrf.mxu1  ;;  %v1294_v13 = vadd.f32 %v1293_v11, %v1292_v9 }
 0x163   : > { %v1332_v14 = vadd.f32 %v1331_v12, %v1330_v10  ;;  %v1295_v16 = vpop.f32.mrf.mxu0 }
 0x164   : > { %v1333_v17 = vpop.f32.mrf.mxu1 }
 0x165   : > { %v731_v18 = vadd.f32 %v1332_v14, %v1294_v13  ;;  %v1296_v19 = vpop.f32.mrf.mxu0 }
 0x166   : > { %v1334_v20 = vpop.f32.mrf.mxu1  ;;  %v1297_v22 = vadd.f32 %v1296_v19, %v1295_v16 }
 0x167   : > { %v739_v21 = vadd.f32 %v731_v18, %v515_v15  ;;  %v1335_v23 = vadd.f32 %v1334_v20, %v1333_v17 }
 0x169   : > { %741 = vst [vmem:[#allocation2] sm:$0xff] %v739_v21  ;;  %v736_v25 = vadd.f32 %v1335_v23, %v1297_v22  ;;  %746 = sbr.rel (%p1247_p6) target bundleno = 1307 (0x51b), region = 92 }
 0x16b   : > { %v740_v26 = vadd.f32 %v736_v25, %v516_v24 }
 0x16d   : > { %742 = vst [vmem:[#allocation2 + $0x8] sm:$0xff] %v740_v26 }
 0x16e   : > { %v749_v29 = vlaneseq  ;;  %v1849_v33 = vmov 0.0   ;;  %v813_v43 = vld [vmem:[#allocation8 + $0x78] sm:$0xff]  ;;  %v812_v44 = vld [vmem:[#allocation8 + $0x70] sm:$0xff]  ;;  %v811_v45 = vld [vmem:[#allocation8 + $0x68] sm:$0xff] }
 0x16f   : > { %1390 = vmatprep.subr.mxu0 %v813_v43  ;;  %v810_v46 = vld [vmem:[#allocation8 + $0x60] sm:$0xff]  ;;  %v809_v47 = vld [vmem:[#allocation8 + $0x58] sm:$0xff]  ;;  %v808_v48 = vld [vmem:[#allocation8 + $0x50] sm:$0xff] }
 0x170   : > { %v747_v27 = vld [vmem:[#allocation2] sm:$0xff]  ;;  %v750_v30 = vand.u32 127, %v749_v29  ;;  %1391 = vmatpush3.msra.mxu0 %v813_v43  ;;  %v807_v49 = vld [vmem:[#allocation8 + $0x48] sm:$0xff]  ;;  %v806_v50 = vld [vmem:[#allocation8 + $0x40] sm:$0xff] }
 0x171   : > { %754 = vadd.xlane.f32.xlu0 %v747_v27  ;;  %1392 = vmatprep.subr.mxu0 %v812_v44  ;;  %v805_v51 = vld [vmem:[#allocation8 + $0x38] sm:$0xff]  ;;  %v804_v52 = vld [vmem:[#allocation8 + $0x30] sm:$0xff]  ;;  %v803_v53 = vld [vmem:[#allocation8 + $0x28] sm:$0xff] }
 0x172   : > { %vm751_vm0 = vcmp.lt.s32.totalorder %v750_v30, 50  ;;  %1393 = vmatpush3.msra.mxu0 %v812_v44  ;;  %v802_v54 = vld [vmem:[#allocation8 + $0x20] sm:$0xff]  ;;  %v801_v55 = vld [vmem:[#allocation8 + $0x18] sm:$0xff]  ;;  %v800_v56 = vld [vmem:[#allocation8 + $0x10] sm:$0xff] }
 0x173   : > { %v1248_v34 = vsel %vm751_vm0, 1.0, %v1849_v33  ;;  %1394 = vmatprep.subr.mxu0 %v811_v45  ;;  %v799_v57 = vld [vmem:[#allocation8 + $0x8] sm:$0xff]  ;;  %v798_v58 = vld [vmem:[#allocation8] sm:$0xff]  ;;  %v913_v59 = vld [vmem:[#allocation9 + $0x78] sm:$0xff] }
 0x174   : > { %v748_v28 = vld [vmem:[#allocation2 + $0x8] sm:$0xff]  ;;  %1395 = vmatpush3.msra.mxu0 %v811_v45  ;;  %v912_v60 = vld [vmem:[#allocation9 + $0x70] sm:$0xff]  ;;  %1425 = vmatprep.subr.mxu1 %v913_v59  ;;  %v911_v61 = vld [vmem:[#allocation9 + $0x68] sm:$0xff] }
 0x175   : > { %756 = vadd.xlane.f32.xlu0 %v748_v28  ;;  %1396 = vmatprep.subr.mxu0 %v810_v46  ;;  %v910_v62 = vld [vmem:[#allocation9 + $0x60] sm:$0xff]  ;;  %v909_v63 = vld [vmem:[#allocation9 + $0x58] sm:$0xff]  ;;  %v908_v0 = vld [vmem:[#allocation9 + $0x50] sm:$0xff] }
 0x176   : > { %1397 = vmatpush3.msra.mxu0 %v810_v46  ;;  %1426 = vmatpush3.msra.mxu1 %v913_v59  ;;  %v907_v1 = vld [vmem:[#allocation9 + $0x48] sm:$0xff]  ;;  %v906_v2 = vld [vmem:[#allocation9 + $0x40] sm:$0xff]  ;;  %v905_v3 = vld [vmem:[#allocation9 + $0x38] sm:$0xff] }
 0x177   : > { %1398 = vmatprep.subr.mxu0 %v809_v47  ;;  %1427 = vmatprep.subr.mxu1 %v912_v60  ;;  %v904_v4 = vld [vmem:[#allocation9 + $0x30] sm:$0xff]  ;;  %v903_v5 = vld [vmem:[#allocation9 + $0x28] sm:$0xff]  ;;  %v902_v6 = vld [vmem:[#allocation9 + $0x20] sm:$0xff] }
 0x178   : > { %1399 = vmatpush3.msra.mxu0 %v809_v47  ;;  %1428 = vmatpush3.msra.mxu1 %v912_v60  ;;  %v1249_v14 = vld [vmem:[%s2210_s3] ss:$0 sm:$0xff]  ;;  %v901_v25 = vld [vmem:[#allocation9 + $0x18] sm:$0xff] }
 0x179   : > { %1400 = vmatprep.subr.mxu0 %v808_v48  ;;  %1429 = vmatprep.subr.mxu1 %v911_v61  ;;  %v1250_v16 = vld [vmem:[%s2211_s4] ss:$0 sm:$0xff]  ;;  %v1013_v29 = vld [vmem:[#allocation11 + $0x78] sm:$0xff] }
 0x17a   : > { %1401 = vmatpush3.msra.mxu0 %v808_v48  ;;  %1430 = vmatpush3.msra.mxu1 %v911_v61  ;;  %v900_v26 = vld [vmem:[#allocation9 + $0x10] sm:$0xff]  ;;  %v1009_v33 = vld [vmem:[#allocation11 + $0x58] sm:$0xff] }
 0x17b   : > { %1402 = vmatprep.subr.mxu0 %v807_v49  ;;  %1431 = vmatprep.subr.mxu1 %v910_v62  ;;  %v1012_v30 = vld [vmem:[#allocation11 + $0x70] sm:$0xff]  ;;  %v1001_v48 = vld [vmem:[#allocation11 + $0x18] sm:$0xff] }
 0x17c   : > { %1403 = vmatpush3.msra.mxu0 %v807_v49  ;;  %1432 = vmatpush3.msra.mxu1 %v910_v62  ;;  %v1000_v49 = vld [vmem:[#allocation11 + $0x10] sm:$0xff] }
 0x17d   : > { %1404 = vmatprep.subr.mxu0 %v806_v50  ;;  %1433 = vmatprep.subr.mxu1 %v909_v63  ;;  %v1253_v59 = vld [vmem:[%s2252_s0] ss:$0 sm:$0xff] }
 0x17e   : > { %1405 = vmatpush3.msra.mxu0 %v806_v50  ;;  %1434 = vmatpush3.msra.mxu1 %v909_v63  ;;  %v999_v50 = vld [vmem:[#allocation11 + $0x8] sm:$0xff] }
 0x17f   : > { %1406 = vmatprep.subr.mxu0 %v805_v51  ;;  %1435 = vmatprep.subr.mxu1 %v908_v0 }
 0x180   : > { %1407 = vmatpush3.msra.mxu0 %v805_v51  ;;  %1436 = vmatpush3.msra.mxu1 %v908_v0  ;;  %v998_v51 = vld [vmem:[#allocation11] sm:$0xff] }
 0x181   : > { %1408 = vmatprep.subr.mxu0 %v804_v52  ;;  %1437 = vmatprep.subr.mxu1 %v907_v1 }
 0x182   : > { %1409 = vmatpush3.msra.mxu0 %v804_v52  ;;  %1438 = vmatpush3.msra.mxu1 %v907_v1  ;;  %v1252_v52 = vld [vmem:[%s2251_s10] ss:$0 sm:$0xff] }
 0x183   : > { %1410 = vmatprep.subr.mxu0 %v803_v53  ;;  %1439 = vmatprep.subr.mxu1 %v906_v2 }
 0x184   : > { %1411 = vmatpush3.msra.mxu0 %v803_v53  ;;  %1440 = vmatpush3.msra.mxu1 %v906_v2 }
 0x185   : > { %1412 = vmatprep.subr.mxu0 %v802_v54  ;;  %1441 = vmatprep.subr.mxu1 %v905_v3 }
 0x186   : > { %1413 = vmatpush3.msra.mxu0 %v802_v54  ;;  %1442 = vmatpush3.msra.mxu1 %v905_v3 }
 0x187   : > { %1414 = vmatprep.subr.mxu0 %v801_v55  ;;  %1443 = vmatprep.subr.mxu1 %v904_v4 }
 0x188   : > { %1415 = vmatpush3.msra.mxu0 %v801_v55  ;;  %1444 = vmatpush3.msra.mxu1 %v904_v4 }
 0x189   : > { %1416 = vmatprep.subr.mxu0 %v800_v56  ;;  %1445 = vmatprep.subr.mxu1 %v903_v5 }
 0x18a   : > { %1417 = vmatpush3.msra.mxu0 %v800_v56  ;;  %1446 = vmatpush3.msra.mxu1 %v903_v5 }
 0x18b   : > { %1418 = vmatprep.subr.mxu0 %v799_v57  ;;  %1447 = vmatprep.subr.mxu1 %v902_v6 }
 0x18c   : > { %1419 = vmatpush3.msra.mxu0 %v799_v57  ;;  %1448 = vmatpush3.msra.mxu1 %v902_v6 }
 0x18d   : > { %1420 = vmatprep.subr.mxu0 %v798_v58  ;;  %1449 = vmatprep.subr.mxu1 %v901_v25 }
 0x18e   : > { %1421 = vmatpush3.msra.mxu0 %v798_v58  ;;  %1450 = vmatpush3.msra.mxu1 %v901_v25 }
 0x18f   : > { %1451 = vmatprep.subr.mxu1 %v900_v26  ;;  %1460 = vmatprep.subr.mxu0 %v1013_v29 }
 0x190   : > { %1452 = vmatpush3.msra.mxu1 %v900_v26 }
 0x1fa   : > { %v755_v31 = vpop.xlane.xlu0 %754 }
 0x1fb   : > { %v758_v32 = vmul.f32 0.02, %v755_v31  ;;  %v1011_v31 = vld [vmem:[#allocation11 + $0x68] sm:$0xff] }
 0x1fd   : > { %v2154_v35 = vsub.f32 %v747_v27, %v758_v32  ;;  %v899_v27 = vld [vmem:[#allocation9 + $0x8] sm:$0xff]  ;;  %v1010_v32 = vld [vmem:[#allocation11 + $0x60] sm:$0xff] }
 0x1fe   : > { %v757_v36 = vpop.xlane.xlu0 %756  ;;  %1453 = vmatprep.subr.mxu1 %v899_v27 }
 0x1ff   : > { %v759_v37 = vmul.f32 0.02, %v757_v36  ;;  %v762_v38 = vmul.f32 %v1248_v34, %v2154_v35  ;;  %1454 = vmatpush3.msra.mxu1 %v899_v27  ;;  %v1006_v36 = vld [vmem:[#allocation11 + $0x40] sm:$0xff] }
 0x201   : > { %v2157_v39 = vsub.f32 %v748_v28, %v759_v37  ;;  %v764_v40 = vmul.f32 %v762_v38, %v762_v38  ;;  %v898_v28 = vld [vmem:[#allocation9] sm:$0xff]  ;;  %v1005_v37 = vld [vmem:[#allocation11 + $0x38] sm:$0xff]  ;;  %v1004_v38 = vld [vmem:[#allocation11 + $0x30] sm:$0xff] }
 0x202   : > { %1455 = vmatprep.subr.mxu1 %v898_v28 }
 0x203   : > { %766 = vadd.xlane.f32.xlu1 %v764_v40  ;;  %v763_v41 = vmul.f32 %v1248_v34, %v2157_v39  ;;  %1456 = vmatpush3.msra.mxu1 %v898_v28  ;;  %v1008_v34 = vld [vmem:[#allocation11 + $0x50] sm:$0xff]  ;;  %v1002_v40 = vld [vmem:[#allocation11 + $0x20] sm:$0xff] }
 0x205   : > { %v765_v42 = vmul.f32 %v763_v41, %v763_v41  ;;  %v1251_v41 = vld [vmem:[%s2213_s6] ss:$0 sm:$0xff] }
 0x207   : > { %768 = vadd.xlane.f32.xlu1 %v765_v42 }
 0x28c   : > { %v767_v7 = vpop.xlane.xlu1 %766 }
 0x28d   : > { %v770_v8 = vmul.f32 0.02, %v767_v7 }
 0x28f   : > { %v772_v9 = vadd.f32 1e-05, %v770_v8 }
 0x290   : > { %v769_v10 = vpop.xlane.xlu1 %768 }
 0x291   : > { %1601 = vrsqrt.f32 %v772_v9  ;;  %v771_v11 = vmul.f32 0.02, %v769_v10 }
 0x293   : > { %v773_v12 = vadd.f32 1e-05, %v771_v11 }
 0x295   : > { %1603 = vrsqrt.f32 %v773_v12 }
 0x29e   : > { %v1602_v13 = vpop.eup %1601 }
 0x29f   : > { %v776_v15 = vmul.f32 %v1602_v13, %v2154_v35  ;;  %v1007_v35 = vld [vmem:[#allocation11 + $0x48] sm:$0xff] }
 0x2a1   : > { %v785_v17 = vmul.f32 %v1249_v14, %v776_v15 }
 0x2a2   : > { %v1604_v18 = vpop.eup %1603 }
 0x2a3   : > { %v777_v19 = vmul.f32 %v1604_v18, %v2157_v39  ;;  %v794_v20 = vadd.f32 %v1250_v16, %v785_v17  ;;  %v1003_v39 = vld [vmem:[#allocation11 + $0x28] sm:$0xff] }
 0x2a5   : > { %v786_v21 = vmul.f32 %v1249_v14, %v777_v19  ;;  %1605 = vtanh.f32 %v794_v20 }
 0x2a7   : > { %v795_v22 = vadd.f32 %v1250_v16, %v786_v21 }
 0x2a9   : > { %1607 = vtanh.f32 %v795_v22 }
 0x2b2   : > { %v1606_v23 = vpop.eup %1605 }
 0x2b3   : > { %1422 = vmatprep.mubr.f32.mxu0 %v1606_v23 }
 0x2b6   : > { %v1608_v24 = vpop.eup %1607 }
 0x2b7   : > { %1423 = vmatmul.mubr.f32.vlgmr.msra.gmra.mxu0 %v1608_v24 }
 0x2b8   : > { %1461 = vmatpush3.msra.mxu0 %v1013_v29 }
 0x2b9   : > { %1462 = vmatprep.subr.mxu0 %v1012_v30 }
 0x2ba   : > { %1463 = vmatpush3.msra.mxu0 %v1012_v30 }
 0x2bb   : > { %1464 = vmatprep.subr.mxu0 %v1011_v31 }
 0x2bc   : > { %1465 = vmatpush3.msra.mxu0 %v1011_v31 }
 0x2bd   : > { %1466 = vmatprep.subr.mxu0 %v1010_v32 }
 0x2be   : > { %1467 = vmatpush3.msra.mxu0 %v1010_v32 }
 0x2bf   : > { %1468 = vmatprep.subr.mxu0 %v1009_v33 }
 0x2c0   : > { %1469 = vmatpush3.msra.mxu0 %v1009_v33 }
 0x2c1   : > { %1470 = vmatprep.subr.mxu0 %v1008_v34 }
 0x2c2   : > { %1471 = vmatpush3.msra.mxu0 %v1008_v34 }
 0x2c3   : > { %1472 = vmatprep.subr.mxu0 %v1007_v35 }
 0x2c4   : > { %1473 = vmatpush3.msra.mxu0 %v1007_v35 }
 0x2c5   : > { %1474 = vmatprep.subr.mxu0 %v1006_v36 }
 0x2c6   : > { %1475 = vmatpush3.msra.mxu0 %v1006_v36 }
 0x2c7   : > { %1476 = vmatprep.subr.mxu0 %v1005_v37 }
 0x2c8   : > { %1477 = vmatpush3.msra.mxu0 %v1005_v37 }
 0x2c9   : > { %1478 = vmatprep.subr.mxu0 %v1004_v38 }
 0x2ca   : > { %1479 = vmatpush3.msra.mxu0 %v1004_v38 }
 0x2cb   : > { %1480 = vmatprep.subr.mxu0 %v1003_v39 }
 0x2cc   : > { %1481 = vmatpush3.msra.mxu0 %v1003_v39 }
 0x2cd   : > { %1482 = vmatprep.subr.mxu0 %v1002_v40 }
 0x2ce   : > { %1483 = vmatpush3.msra.mxu0 %v1002_v40 }
 0x2cf   : > { %1484 = vmatprep.subr.mxu0 %v1001_v48 }
 0x2d0   : > { %1485 = vmatpush3.msra.mxu0 %v1001_v48 }
 0x2d1   : > { %1486 = vmatprep.subr.mxu0 %v1000_v49 }
 0x2d2   : > { %1487 = vmatpush3.msra.mxu0 %v1000_v49 }
 0x2d3   : > { %1488 = vmatprep.subr.mxu0 %v999_v50 }
 0x2d4   : > { %1489 = vmatpush3.msra.mxu0 %v999_v50 }
 0x2d5   : > { %1490 = vmatprep.subr.mxu0 %v998_v51 }
 0x2d6   : > { %1491 = vmatpush3.msra.mxu0 %v998_v51 }
 0x377   : > { %v1424_v42 = vpop.f32.mrf.mxu0 }
 0x378   : > { %v893_v43 = vadd.f32 %v1424_v42, %v1251_v41 }
 0x379   : > { %v887_v44 = vpop.f32.mrf.mxu0 }
 0x37a   : > { %v888_v45 = vadd.f32 %v1251_v41, %v887_v44  ;;  %v897_v47 = vmax.f32 %v893_v43, 0.0 }
 0x37c   : > { %v896_v46 = vmax.f32 %v888_v45, 0.0 }
 0x37e   : > { %1457 = vmatprep.mubr.f32.mxu1 %v896_v46 }
 0x37f   : > { %1458 = vmatmul.mubr.f32.vlgmr.msra.gmra.mxu1 %v897_v47 }
 0x43f   : > { %v1459_v53 = vpop.f32.mrf.mxu1 }
 0x440   : > { %v993_v54 = vadd.f32 %v1459_v53, %v1252_v52 }
 0x441   : > { %v987_v55 = vpop.f32.mrf.mxu1 }
 0x442   : > { %v988_v56 = vadd.f32 %v1252_v52, %v987_v55  ;;  %v997_v58 = vmax.f32 %v993_v54, 0.0 }
 0x444   : > { %v996_v57 = vmax.f32 %v988_v56, 0.0 }
 0x446   : > { %1492 = vmatprep.mubr.f32.mxu0 %v996_v57 }
 0x447   : > { %1493 = vmatmul.mubr.f32.vlgmr.msra.gmra.mxu0 %v997_v58 }
 0x507   : > { %v1494_v60 = vpop.f32.mrf.mxu0 }
 0x508   : > { %v1093_v61 = vadd.f32 %v1494_v60, %v1253_v59 }
 0x509   : > { %v1087_v62 = vpop.f32.mrf.mxu0 }
 0x50a   : > { %1609 = vtanh.f32 %v1093_v61  ;;  %v1088_v63 = vadd.f32 %v1253_v59, %v1087_v62 }
 0x50c   : > { %1611 = vtanh.f32 %v1088_v63 }
 0x517   : > { %v1610_v0 = vpop.eup %1609 }
 0x518   : > { %1099 = vst [vmem:[#allocation12 + $0x8] sm:$0xff] %v1610_v0 }
 0x519   : > { %v1612_v1 = vpop.eup %1611 }
 0x51a   : > { %1098 = vst [vmem:[#allocation12] sm:$0xff] %v1612_v1 }
 0x51b PF: > { %p1539_p1 = scmp.eq.s32.totalorder %s1942_s23, 1  ;;  %s1850_s15 = smov [#allocation12]  }
 0x51c   : > { %s1109_s9 = sshll.u32 %s1850_s15, 4  ;;  %s1110_s9 = int_to_ptr.vmem [resolvable:$true] %s1109_s9 }
 0x51d   : > { %s1747_s22 = scalar_lea.vmem %s1110_s9, 256  ;;  %p1754_p5 = scmp.lt.s32.totalorder %s1110_s9, %s1110_s9 }
 0x51e   : > { %p1748_p3 = scmp.ne.s32.totalorder %s1110_s9, %s1747_s22  ;;  %p1755_p7 = scmp.lt.s32.totalorder %s1747_s22, %s1747_s22 }
 0x520   : > { %p1749_p13 = pnand %p1748_p3, %p1539_p1  ;;  %p1756_p9 = por %p1755_p7, %p1754_p5 }
 0x522   : > { %p1750_p11 = pneg %p1749_p13 }
 0x524   : > { %p1757_p4 = pnand %p1756_p9, %p1750_p11 }
 0x526   : > { %1760 = shalt.err (!%p1757_p4)
}
 0x527   : > { %s1851_s12 = smov 128   ;;  %s1852_s14 = smov 8  }
 0x528   : > { %s2253_s7 = sld [smem:[#allocation28_spill]] }
 0x52e   : > { %1512 = dma.vmem_to_hbm [thread:$0]  (%p1539_p1), %s1110_s9, 256, %s2253_s7, [#allocation5], %s1851_s12, %s1851_s12, %s1852_s14  }
 0x52f   : > { %1812 = dma.done.wait (%p1539_p1), [#allocation5], 256  }
 0x530   : > { %1814 = vsyncadd (%p1539_p1), [#allocation5], 4294967040 }
 0x531 PF: > { %s2254_s30 = sld [smem:[#allocation19_spill]]  ;;  %s2258_s17 = smov %s1821_s18 }
 0x532   : > { %s2255_s26 = sld [smem:[#allocation18_spill]]  ;;  %s2260_s20 = smov %s1833_s21 }
 0x533   : > { %s2256_s19 = sld [smem:[#allocation21_spill]] }
 0x534   : > { %s2257_s13 = sld [smem:[#allocation20_spill]] }
 0x537   : > { %s29_s22 = sadd.s32 1, %s2254_s30  }
 0x538   : > { %p26_p8 = scmp.ge.s32.totalorder %s29_s22, 4   ;;  %s2259_s18 = smov %s2255_s26 }
 0x53a   : > { %s2261_s21 = smov %s2257_s13  ;;  %28 = sbr.rel (!%p26_p8) target bundleno = 16 (0x10), region = 135 }
 0x53f   :  { %1125 = vsyncpa [#allocation4], 1 }
 0x540   :  { %1127 = vsyncpa [#allocation4 + $0x1], 1 }
 0x541   :  { %1128 = vsyncpa [#allocation7], 1 }
 0x542   :  { %1130 = vsyncpa [#allocation7 + $0x1], 1 }
 0x543   :  { %1131 = vsyncpa [#allocation10], 1 }
 0x544   :  { %1132 = vsyncpa [#allocation5], 1 }
 0x545   :  { %1134 = vsyncpa [#allocation5 + $0x1], 1 }

</bundles_post_ra>
